<compile_context>
chip_gen: v7x
topology: tpu7x:2x2x1
jax: 0.10.0
libtpu: 0.0.40
codegen_flags: <defaults>
</compile_context>

<pallas_src>
import jax
import jax.numpy as jnp
from jax.experimental import pallas as pl
from jax.experimental.pallas import tpu as pltpu


def _critic_kernel(obs_t_ref, w1t_ref, b1_ref, w2t_ref, b2_ref,
                   wmu_ref, bmu_ref, mu_ref):
    # obs_t_ref : (obs_dim, TB)  -- batch on lanes (lane-dense activations throughout)
    x = obs_t_ref[...]
    h1 = jnp.tanh(
        jnp.dot(w1t_ref[...], x, preferred_element_type=jnp.float32) + b1_ref[...]
    )                                                         # (h1, TB)
    h2 = jnp.tanh(
        jnp.dot(w2t_ref[...], h1, preferred_element_type=jnp.float32) + b2_ref[...]
    )                                                         # (h2, TB)
    # Folded head bank: single matvec instead of 2 head matmuls + add + lane-mean.
    mu = jnp.dot(wmu_ref[...], h2, preferred_element_type=jnp.float32) + bmu_ref[...]
    mu_ref[...] = mu                                          # (1, TB) lane-dense store


def prepare_kernel_params(params):
    """Host-side algebraic fold + transpose into the kernel's lane-dense layout."""
    h1 = params["w1"].shape[1]
    h2 = params["w2"].shape[1]
    w1t = params["w1"].T                     # (h1, obs_dim)
    b1c = params["b1"].reshape(h1, 1)        # (h1, 1)
    w2t = params["w2"].T                     # (h2, h1)
    b2c = params["b2"].reshape(h2, 1)        # (h2, 1)
    # mean over heads of (out + prior) is linear in the heads -> fold exactly.
    w_mu = jnp.mean(params["wh"] + params["wph"], axis=1).reshape(1, h2)   # (1, h2)
    b_mu = jnp.mean(params["bh"] + params["bph"]).reshape(1, 1)            # (1, 1)
    return w1t, b1c, w2t, b2c, w_mu, b_mu


def mlp_critic_uncertainty_forward(obs, params, *, tb=256):
    """Returns mu of shape (B,) — matches MLPCriticUncertainty.forward (active_heads=None)."""
    B, obs_dim = obs.shape
    w1t, b1c, w2t, b2c, w_mu, b_mu = prepare_kernel_params(params)
    h1 = w1t.shape[0]
    h2 = w2t.shape[0]

    n_tiles = pl.cdiv(B, tb)
    bp = n_tiles * tb
    obs_p = jnp.pad(obs, ((0, bp - B), (0, 0))) if bp != B else obs
    obs_t = obs_p.T                          # (obs_dim, Bp) -- layout plumbing only

    flops = 2 * bp * (obs_dim * h1 + h1 * h2 + h2)
    transcendentals = bp * (h1 + h2)
    bytes_accessed = 4 * (obs_t.size + w1t.size + b1c.size + w2t.size
                          + b2c.size + w_mu.size + b_mu.size + bp)

    mu_tiles = pl.pallas_call(
        _critic_kernel,
        out_shape=jax.ShapeDtypeStruct((n_tiles, 1, tb), jnp.float32),
        grid=(n_tiles,),
        in_specs=[
            pl.BlockSpec((obs_dim, tb), lambda i: (0, i)),     # obs tile (batch on lanes)
            pl.BlockSpec((h1, obs_dim), lambda i: (0, 0)),     # weights: VMEM-resident
            pl.BlockSpec((h1, 1), lambda i: (0, 0)),
            pl.BlockSpec((h2, h1), lambda i: (0, 0)),
            pl.BlockSpec((h2, 1), lambda i: (0, 0)),
            pl.BlockSpec((1, h2), lambda i: (0, 0)),
            pl.BlockSpec((1, 1), lambda i: (0, 0)),
        ],
        out_specs=pl.BlockSpec((None, 1, tb), lambda i: (i, 0, 0)),
        compiler_params=pltpu.CompilerParams(
            dimension_semantics=("parallel",)),                # megacore on v7x
        cost_estimate=pl.CostEstimate(
            flops=int(flops),
            transcendentals=int(transcendentals),
            bytes_accessed=int(bytes_accessed)),
    )(obs_t, w1t, b1c, w2t, b2c, w_mu, b_mu)

    return mu_tiles.reshape(bp)[:B]


def init_params(key, obs_dim, hidden_sizes, num_heads):
    h1, h2 = hidden_sizes
    keys = jax.random.split(key, 4)

    def lin(k, fan_in, fan_out):
        # PyTorch-style uniform init with bound 1/sqrt(fan_in).
        bound = 1.0 / jnp.sqrt(jnp.float32(fan_in))
        kw, kb = jax.random.split(k)
        w = jax.random.uniform(kw, (fan_in, fan_out), jnp.float32, -bound, bound)
        b = jax.random.uniform(kb, (1, fan_out), jnp.float32, -bound, bound)
        return w, b

    w1, b1 = lin(keys[0], obs_dim, h1)
    w2, b2 = lin(keys[1], h1, h2)
    # num_heads independent (h2 -> 1) heads fused into (h2, num_heads) matrices.
    wh, bh = lin(keys[2], h2, num_heads)
    wph, bph = lin(keys[3], h2, num_heads)
    return dict(w1=w1, b1=b1, w2=w2, b2=b2, wh=wh, bh=bh, wph=wph, bph=bph)


def reference_forward(obs, params):
    """Pure-JAX reference mirroring the unfused PyTorch math (no head folding)."""
    x = jnp.tanh(obs @ params["w1"] + params["b1"])
    x = jnp.tanh(x @ params["w2"] + params["b2"])
    out = x @ params["wh"] + params["bh"]            # (B, num_heads)
    prior = x @ params["wph"] + params["bph"]        # (B, num_heads) (shared trunk)
    return jnp.mean(out + prior, axis=-1)            # (B,)


if __name__ == "__main__":
    obs_dim = 16
    hidden_sizes = (32, 32)
    num_heads = 7
    batch = 8

    key = jax.random.PRNGKey(0)
    k_obs, k_params = jax.random.split(key)
    obs = jax.random.normal(k_obs, (batch, obs_dim), dtype=jnp.float32)
    params = init_params(k_params, obs_dim, hidden_sizes, num_heads)

    mu = mlp_critic_uncertainty_forward(obs, params)
    mu = jax.block_until_ready(mu)

    mu_ref = reference_forward(obs, params)
    assert mu.shape == (batch,)
    assert jnp.allclose(mu, mu_ref, atol=1e-5, rtol=1e-5)

    print("KERNEL_OK")
</pallas_src>

<mosaic_0001>
module attributes {stable_mosaic.version = 11 : i64} {
  func.func @_critic_kernel(%arg0: i32, %arg1: memref<16x256xf32, #tpu.memory_space<vmem>>, %arg2: memref<32x16xf32, #tpu.memory_space<vmem>>, %arg3: memref<32x1xf32, #tpu.memory_space<vmem>>, %arg4: memref<32x32xf32, #tpu.memory_space<vmem>>, %arg5: memref<32x1xf32, #tpu.memory_space<vmem>>, %arg6: memref<1x32xf32, #tpu.memory_space<vmem>>, %arg7: memref<1x1xf32, #tpu.memory_space<vmem>>, %arg8: memref<1x1x256xf32, #tpu.memory_space<vmem>>) attributes {dimension_semantics = [#tpu.dimension_semantics<parallel>], iteration_bounds = array<i64: 1>, scalar_prefetch = 0 : i64, scratch_operands = 0 : i64, tpu.core_type = #tpu.core_type<tc>, window_params = [{transform_indices = @transform_0, window_bounds = array<i64: 16, 256>}, {pipeline_mode = #tpu.pipeline_mode<synchronous>, transform_indices = @transform_1, window_bounds = array<i64: 32, 16>}, {pipeline_mode = #tpu.pipeline_mode<synchronous>, transform_indices = @transform_2, window_bounds = array<i64: 32, 1>}, {pipeline_mode = #tpu.pipeline_mode<synchronous>, transform_indices = @transform_3, window_bounds = array<i64: 32, 32>}, {pipeline_mode = #tpu.pipeline_mode<synchronous>, transform_indices = @transform_4, window_bounds = array<i64: 32, 1>}, {pipeline_mode = #tpu.pipeline_mode<synchronous>, transform_indices = @transform_5, window_bounds = array<i64: 1, 32>}, {pipeline_mode = #tpu.pipeline_mode<synchronous>, transform_indices = @transform_6, window_bounds = array<i64: 1, 1>}, {transform_indices = @transform_7, window_bounds = array<i64: 1, 1, 256>}]} {
    %c0 = arith.constant 0 : index
    %c0_0 = arith.constant 0 : index
    %0 = vector.load %arg1[%c0, %c0_0] : memref<16x256xf32, #tpu.memory_space<vmem>>, vector<16x256xf32>
    %c0_1 = arith.constant 0 : index
    %c0_2 = arith.constant 0 : index
    %1 = vector.load %arg2[%c0_1, %c0_2] : memref<32x16xf32, #tpu.memory_space<vmem>>, vector<32x16xf32>
    %cst = arith.constant dense<0.000000e+00> : vector<32x256xf32>
    %2 = tpu.matmul %1, %0, %cst {dimension_numbers = #tpu.dot_dimension_numbers<[1], [0], [0], [1], [0, 0, 1, 1], [], []>} : vector<32x16xf32>, vector<16x256xf32>, vector<32x256xf32> -> vector<32x256xf32>
    %c0_3 = arith.constant 0 : index
    %c0_4 = arith.constant 0 : index
    %3 = vector.load %arg3[%c0_3, %c0_4] : memref<32x1xf32, #tpu.memory_space<vmem>>, vector<32x1xf32>
    %4 = vector.broadcast %3 : vector<32x1xf32> to vector<32x256xf32>
    %5 = arith.addf %2, %4 : vector<32x256xf32>
    %6 = math.tanh %5 : vector<32x256xf32>
    %c0_5 = arith.constant 0 : index
    %c0_6 = arith.constant 0 : index
    %7 = vector.load %arg4[%c0_5, %c0_6] : memref<32x32xf32, #tpu.memory_space<vmem>>, vector<32x32xf32>
    %cst_7 = arith.constant dense<0.000000e+00> : vector<32x256xf32>
    %8 = tpu.matmul %7, %6, %cst_7 {dimension_numbers = #tpu.dot_dimension_numbers<[1], [0], [0], [1], [0, 0, 1, 1], [], []>} : vector<32x32xf32>, vector<32x256xf32>, vector<32x256xf32> -> vector<32x256xf32>
    %c0_8 = arith.constant 0 : index
    %c0_9 = arith.constant 0 : index
    %9 = vector.load %arg5[%c0_8, %c0_9] : memref<32x1xf32, #tpu.memory_space<vmem>>, vector<32x1xf32>
    %10 = vector.broadcast %9 : vector<32x1xf32> to vector<32x256xf32>
    %11 = arith.addf %8, %10 : vector<32x256xf32>
    %12 = math.tanh %11 : vector<32x256xf32>
    %c0_10 = arith.constant 0 : index
    %c0_11 = arith.constant 0 : index
    %13 = vector.load %arg6[%c0_10, %c0_11] : memref<1x32xf32, #tpu.memory_space<vmem>>, vector<1x32xf32>
    %cst_12 = arith.constant dense<0.000000e+00> : vector<1x256xf32>
    %14 = tpu.matmul %13, %12, %cst_12 {dimension_numbers = #tpu.dot_dimension_numbers<[1], [0], [0], [1], [0, 0, 1, 1], [], []>} : vector<1x32xf32>, vector<32x256xf32>, vector<1x256xf32> -> vector<1x256xf32>
    %c0_13 = arith.constant 0 : index
    %c0_14 = arith.constant 0 : index
    %15 = vector.load %arg7[%c0_13, %c0_14] : memref<1x1xf32, #tpu.memory_space<vmem>>, vector<1x1xf32>
    %16 = vector.broadcast %15 : vector<1x1xf32> to vector<1x256xf32>
    %17 = arith.addf %14, %16 : vector<1x256xf32>
    %c0_15 = arith.constant 0 : index
    %c0_16 = arith.constant 0 : index
    %c0_17 = arith.constant 0 : index
    %18 = vector.load %arg8[%c0_15, %c0_16, %c0_17] : memref<1x1x256xf32, #tpu.memory_space<vmem>>, vector<1x1x256xf32>
    %19 = vector.shape_cast %18 : vector<1x1x256xf32> to vector<1x256xf32>
    %20 = vector.shape_cast %17 : vector<1x256xf32> to vector<1x1x256xf32>
    tpu.vector_store %arg8[%c0_15, %c0_16, %c0_17], %20 {strides = array<i32>} : memref<1x1x256xf32, #tpu.memory_space<vmem>>, vector<1x1x256xf32>,
    return
  }
  func.func @transform_0(%arg0: i32) -> (i32, i32) {
    %c0_i32 = arith.constant 0 : i32
    %c0_i32_0 = arith.constant 0 : i32
    return %c0_i32, %arg0 : i32, i32
  }
  func.func @transform_1(%arg0: i32) -> (i32, i32) {
    %c0_i32 = arith.constant 0 : i32
    %c0_i32_0 = arith.constant 0 : i32
    %c0_i32_1 = arith.constant 0 : i32
    return %c0_i32, %c0_i32_0 : i32, i32
  }
  func.func @transform_2(%arg0: i32) -> (i32, i32) {
    %c0_i32 = arith.constant 0 : i32
    %c0_i32_0 = arith.constant 0 : i32
    %c0_i32_1 = arith.constant 0 : i32
    return %c0_i32, %c0_i32_0 : i32, i32
  }
  func.func @transform_3(%arg0: i32) -> (i32, i32) {
    %c0_i32 = arith.constant 0 : i32
    %c0_i32_0 = arith.constant 0 : i32
    %c0_i32_1 = arith.constant 0 : i32
    return %c0_i32, %c0_i32_0 : i32, i32
  }
  func.func @transform_4(%arg0: i32) -> (i32, i32) {
    %c0_i32 = arith.constant 0 : i32
    %c0_i32_0 = arith.constant 0 : i32
    %c0_i32_1 = arith.constant 0 : i32
    return %c0_i32, %c0_i32_0 : i32, i32
  }
  func.func @transform_5(%arg0: i32) -> (i32, i32) {
    %c0_i32 = arith.constant 0 : i32
    %c0_i32_0 = arith.constant 0 : i32
    %c0_i32_1 = arith.constant 0 : i32
    return %c0_i32, %c0_i32_0 : i32, i32
  }
  func.func @transform_6(%arg0: i32) -> (i32, i32) {
    %c0_i32 = arith.constant 0 : i32
    %c0_i32_0 = arith.constant 0 : i32
    %c0_i32_1 = arith.constant 0 : i32
    return %c0_i32, %c0_i32_0 : i32, i32
  }
  func.func @transform_7(%arg0: i32) -> (i32, i32, i32) {
    %c0_i32 = arith.constant 0 : i32
    %c0_i32_0 = arith.constant 0 : i32
    %c0_i32_1 = arith.constant 0 : i32
    return %arg0, %c0_i32, %c0_i32_0 : i32, i32, i32
  }
}

</mosaic_0001>

<bundles_post_ra>
// kernel: tpu_custom_call.1
= control target key start
LH: loop header
LB: loop body
LE: loop exit
PB: predicated region body
PF: predicated region fallthrough
CT: control target
= control target key end

     0   :  { %s662_s0 = inlined_call_operand.vmem [shape: f32[16,256], index: 0, kind: input, shape index: {}]   ;;  %s663_s1 = inlined_call_operand.vmem [shape: f32[32,16], index: 1, kind: input, shape index: {}]   ;;  %s664_s2 = inlined_call_operand.vmem [shape: f32[32,1], index: 2, kind: input, shape index: {}]   ;;  %s665_s3 = inlined_call_operand.vmem [shape: f32[32,32], index: 3, kind: input, shape index: {}]   ;;  %s666_s4 = inlined_call_operand.vmem [shape: f32[32,1], index: 4, kind: input, shape index: {}]   ;;  %s667_s5 = inlined_call_operand.vmem [shape: f32[1,32], index: 5, kind: input, shape index: {}]   ;;  %s668_s6 = inlined_call_operand.<no memory space> [shape: f32[1,1], index: 6, kind: input, shape index: {}]   ;;  %s669_s7 = inlined_call_operand.hbm [shape: f32[1,1,256], index: 7, kind: output, shape index: {}]  }
   0x1   :  { %v12_v0 = vstv %s668_s6 }
   0x2   :  { %13 = vst [vmem:[#allocation2] sm:$0x1] %v12_v0 }
   0x3   :  { %v30_v1 = vld [vmem:[%s662_s0 + $0x8] sm:$0xff]  ;;  %v32_v2 = vld [vmem:[%s662_s0 + $0x18] sm:$0xff]  ;;  %v29_v3 = vld [vmem:[%s662_s0] sm:$0xff]  ;;  %v522_v6 = vmov 0.0   ;;  %v523_v7 = vmov 0   ;;  %vm61_vm0 = vcmask 130048  }
   0x4   :  { %v440_v4 = vpack.c.bf16 %v32_v2, %v30_v1  ;;  %v31_v5 = vld [vmem:[%s662_s0 + $0x10] sm:$0xff]  ;;  %138 = vmatprep.mubr.f32.mxu0 %v522_v6  ;;  %464 = vset.pattern.permute.xlu0 %v523_v7  ;;  %v37_v9 = vld [vmem:[%s664_s2] sm:$0xff]  ;;  %v38_v12 = vld [vmem:[%s664_s2 + $0x8] sm:$0xff] }
   0x5   :  { %v442_v8 = vpack.c.bf16 %v31_v5, %v29_v3  ;;  %465 = vset.pattern.permute.xlu1 %v523_v7  ;;  %276 = vmatprep.mubr.f32.mxu1 %v522_v6  ;;  %v39_v10 = vld [vmem:[%s664_s2 + $0x10] sm:$0xff]  ;;  %v33_v11 = vld [vmem:[%s663_s1] sm:$0xff]  ;;  %v40_v13 = vld [vmem:[%s664_s2 + $0x18] sm:$0xff] }
   0x6   :  { %441 = vmatprep.subr.bf16.mxu0 %v440_v4  ;;  %43 = vperm.xlu0 %464, %v37_v9  }
   0x7   :  { %443 = vmatpush1.bf16.msra.mxu0 %v442_v8  ;;  %53 = vperm.xlu1 %465, %v39_v10  }
   0x8   :  { %14 = vsyncpa [#allocation4], 0  ;;  %v34_v14 = vld [vmem:[%s663_s1 + $0x8] sm:$0xff]  ;;  %v175_v15 = vld [vmem:[%s666_s4] sm:$0xff]  ;;  %vm199_vm1 = vcmask 261120   ;;  %s525_s14 = smov [#allocation3]  }
   0x9   :  { %v176_v16 = vld [vmem:[%s666_s4 + $0x8] sm:$0xff]  ;;  %v35_v17 = vld [vmem:[%s663_s1 + $0x10] sm:$0xff]  ;;  %v178_v19 = vld [vmem:[%s666_s4 + $0x18] sm:$0xff]  ;;  %s423_s15 = sshll.u32 %s525_s14, 4  ;;  %s424_s15 = int_to_ptr.vmem [resolvable:$true] %s423_s15 }
   0xa   :  { %431 = vmatmul.mubr.msk.f32.vlgmr.msra.gmra.mrb[0].mxu0 %vm61_vm0, %v33_v11  ;;  %48 = vperm.xlu0 %464, %v38_v12   ;;  %v177_v18 = vld [vmem:[%s666_s4 + $0x10] sm:$0xff]  ;;  %v36_v20 = vld [vmem:[%s663_s1 + $0x18] sm:$0xff]  ;;  %v310_v21 = vld [vmem:[#allocation2] sm:$0x1]  ;;  %p503_p1 = scmp.lt.s32.totalorder %s424_s15, %s424_s15 }
   0xb   :  { %144 = vmatprep.mubr.f32.mxu0 %v522_v6  ;;  %58 = vperm.xlu1 %465, %v40_v13   ;;  %v171_v54 = vld [vmem:[%s665_s3] sm:$0xff]  ;;  %v172_v55 = vld [vmem:[%s665_s3 + $0x8] sm:$0xff]  ;;  %v173_v56 = vld [vmem:[%s665_s3 + $0x10] sm:$0xff] }
   0xc   :  { %v174_v57 = vld [vmem:[%s665_s3 + $0x18] sm:$0xff] }
   0xe   :  { %432 = vmatmul.mubr.msk.f32.gmra.mrb[2].mxu0 %vm61_vm0, %v34_v14  ;;  %181 = vperm.xlu0 %464, %v175_v15  }
   0xf   :  { %150 = vmatprep.mubr.f32.mxu0 %v522_v6  ;;  %186 = vperm.xlu1 %465, %v176_v16  }
  0x12   :  { %433 = vmatmul.mubr.msk.f32.gmra.mrb[4].mxu0 %vm61_vm0, %v35_v17  ;;  %191 = vperm.xlu0 %464, %v177_v18  }
  0x13   :  { %156 = vmatprep.mubr.f32.mxu0 %v522_v6  ;;  %196 = vperm.xlu1 %465, %v178_v19  }
  0x16   :  { %434 = vmatmul.mubr.msk.f32.gmra.mrb[6].mxu0 %vm61_vm0, %v36_v20  ;;  %313 = vperm.xlu0 %464, %v310_v21  }
  0x17   :  { %387 = vmatprep.mubr.f32.mxu0 %v522_v6 }
  0x85   :  { %v44_v22 = vpop.permute.xlu0 %43 }
  0x86   :  { %v54_v31 = vpop.permute.xlu1 %53 }
  0x89   :  { %v49_v27 = vpop.permute.xlu0 %48 }
  0x8a   :  { %v59_v37 = vpop.permute.xlu1 %58 }
  0x8d   :  { %v182_v58 = vpop.permute.xlu0 %181 }
  0x8e   :  { %v187_v63 = vpop.permute.xlu1 %186 }
  0x91   :  { %v192_v4 = vpop.permute.xlu0 %191 }
  0x92   :  { %v197_v9 = vpop.permute.xlu1 %196 }
  0xdd   :  { %v140_v23 = vpop.f32.mrb[0].mxu0 }
  0xde   :  { %v141_v24 = vadd.f32 %v140_v23, %v44_v22  ;;  %v142_v25 = vpop.f32.mrb[1].mxu0 }
  0xdf   :  { %v143_v26 = vadd.f32 %v142_v25, %v44_v22 }
  0xe0   :  { %466 = vtanh.f32 %v141_v24 }
  0xe1   :  { %v146_v28 = vpop.f32.mrb[2].mxu0  ;;  %468 = vtanh.f32 %v143_v26  ;;  %v309_v26 = vld [vmem:[%s667_s5] sm:$0x1]  ;;  %s498_s5 = scalar_lea.vmem %s424_s15, 32 }
  0xe2   :  { %v147_v29 = vadd.f32 %v146_v28, %v49_v27  ;;  %v148_v30 = vpop.f32.mrb[3].mxu0  ;;  %p499_p0 = scmp.ne.s32.totalorder %s424_s15, %s498_s5  ;;  %p504_p2 = scmp.lt.s32.totalorder %s498_s5, %s498_s5 }
  0xe3   :  { %v149_v32 = vadd.f32 %v148_v30, %v49_v27  ;;  %v316_v27 = vlaneseq }
  0xe4   :  { %470 = vtanh.f32 %v147_v29  ;;  %v524_v29 = vmov 1966171168   ;;  %p505_p3 = por %p504_p2, %p503_p1 }
  0xe5   :  { %472 = vtanh.f32 %v149_v32  ;;  %v152_v33 = vpop.f32.mrb[4].mxu0  ;;  %v317_v28 = vshrl.u32 %v316_v27, 7  ;;  %v398_v30 = vunpack.c.l.s4 %v524_v29  ;;  %v314_v32 = vpop.permute.xlu0 %313  ;;  %vm414_vm2 = vcmp.lt.s32.totalorder %v316_v27, 256 }
  0xe6   :  { %v153_v34 = vadd.f32 %v152_v33, %v54_v31  ;;  %v154_v35 = vpop.f32.mrb[5].mxu0  ;;  %p506_p4 = pnand %p505_p3, %p499_p0 }
  0xe7   :  { %v155_v36 = vadd.f32 %v154_v35, %v54_v31  ;;  %v318_v31 = vsub.s32 0, %v317_v28  ;;  %v399_v33 = vunpack.c.0.s8 %v398_v30 }
  0xe8   :  { %474 = vtanh.f32 %v153_v34 }
  0xe9   :  { %v158_v38 = vpop.f32.mrb[6].mxu0  ;;  %476 = vtanh.f32 %v155_v36  ;;  %v319_v34 = vrot.slane %v314_v32, %v318_v31 }
  0xea   :  { %v159_v39 = vadd.f32 %v158_v38, %v59_v37  ;;  %v160_v40 = vpop.f32.mrb[7].mxu0  ;;  %v467_v42 = vpop.eup %466 }
  0xeb   :  { %v161_v41 = vadd.f32 %v160_v40, %v59_v37  ;;  %v469_v43 = vpop.eup %468 }
  0xec   :  { %478 = vtanh.f32 %v159_v39  ;;  %v402_v39 = vsub.s32 %v399_v33, %v317_v28 }
  0xed   :  { %480 = vtanh.f32 %v161_v41 }
  0xee   :  { %v471_v44 = vpop.eup %470 }
  0xef   :  { %v473_v45 = vpop.eup %472  ;;  %v446_v46 = vpack.c.bf16 %v471_v44, %v467_v42 }
  0xf0   :  { %v444_v47 = vpack.c.bf16 %v473_v45, %v469_v43 }
  0xf2   :  { %445 = vmatprep.subr.bf16.mxu1 %v444_v47  ;;  %v475_v48 = vpop.eup %474 }
  0xf3   :  { %447 = vmatpush1.bf16.msra.mxu1 %v446_v46  ;;  %v477_v49 = vpop.eup %476 }
  0xf6   :  { %v479_v50 = vpop.eup %478 }
  0xf7   :  { %v481_v51 = vpop.eup %480  ;;  %v450_v52 = vpack.c.bf16 %v479_v50, %v475_v48 }
  0xf8   :  { %v448_v53 = vpack.c.bf16 %v481_v51, %v477_v49 }
  0xfa   :  { %449 = vmatprep.subr.bf16.mxu1 %v448_v53 }
  0xfb   :  { %451 = vmatpush1.bf16.msra.mxu1 %v450_v52 }
  0xfe   :  { %435 = vmatmul.mubr.msk.f32.vlgmr.msra.gmra.mrb[0].mxu1 %vm199_vm1, %v171_v54 }
  0xff   :  { %282 = vmatprep.mubr.f32.mxu1 %v522_v6 }
 0x102   :  { %436 = vmatmul.mubr.msk.f32.gmra.mrb[2].mxu1 %vm199_vm1, %v172_v55 }
 0x103   :  { %288 = vmatprep.mubr.f32.mxu1 %v522_v6 }
 0x106   :  { %437 = vmatmul.mubr.msk.f32.gmra.mrb[4].mxu1 %vm199_vm1, %v173_v56 }
 0x107   :  { %294 = vmatprep.mubr.f32.mxu1 %v522_v6 }
 0x10a   :  { %438 = vmatmul.mubr.msk.f32.gmra.mrb[6].mxu1 %vm199_vm1, %v174_v57 }
 0x1d1   :  { %v278_v59 = vpop.f32.mrb[0].mxu1 }
 0x1d2   :  { %v279_v60 = vadd.f32 %v278_v59, %v182_v58  ;;  %v280_v61 = vpop.f32.mrb[1].mxu1 }
 0x1d3   :  { %v281_v62 = vadd.f32 %v280_v61, %v182_v58 }
 0x1d4   :  { %482 = vtanh.f32 %v279_v60 }
 0x1d5   :  { %v284_v0 = vpop.f32.mrb[2].mxu1  ;;  %484 = vtanh.f32 %v281_v62 }
 0x1d6   :  { %v285_v1 = vadd.f32 %v284_v0, %v187_v63  ;;  %v286_v2 = vpop.f32.mrb[3].mxu1 }
 0x1d7   :  { %v287_v3 = vadd.f32 %v286_v2, %v187_v63 }
 0x1d8   :  { %486 = vtanh.f32 %v285_v1 }
 0x1d9   :  { %488 = vtanh.f32 %v287_v3  ;;  %v290_v5 = vpop.f32.mrb[4].mxu1 }
 0x1da   :  { %v291_v6 = vadd.f32 %v290_v5, %v192_v4  ;;  %v292_v7 = vpop.f32.mrb[5].mxu1 }
 0x1db   :  { %v293_v8 = vadd.f32 %v292_v7, %v192_v4 }
 0x1dc   :  { %490 = vtanh.f32 %v291_v6 }
 0x1dd   :  { %v296_v10 = vpop.f32.mrb[6].mxu1  ;;  %492 = vtanh.f32 %v293_v8 }
 0x1de   :  { %v297_v11 = vadd.f32 %v296_v10, %v197_v9  ;;  %v298_v12 = vpop.f32.mrb[7].mxu1  ;;  %v483_v14 = vpop.eup %482 }
 0x1df   :  { %v299_v13 = vadd.f32 %v298_v12, %v197_v9  ;;  %v485_v15 = vpop.eup %484 }
 0x1e0   :  { %494 = vtanh.f32 %v297_v11 }
 0x1e1   :  { %496 = vtanh.f32 %v299_v13 }
 0x1e2   :  { %v487_v16 = vpop.eup %486 }
 0x1e3   :  { %v489_v17 = vpop.eup %488  ;;  %v454_v18 = vpack.c.bf16 %v487_v16, %v483_v14 }
 0x1e4   :  { %v452_v19 = vpack.c.bf16 %v489_v17, %v485_v15 }
 0x1e6   :  { %453 = vmatprep.subr.bf16.mxu0 %v452_v19  ;;  %v491_v20 = vpop.eup %490 }
 0x1e7   :  { %455 = vmatpush1.bf16.msra.mxu0 %v454_v18  ;;  %v493_v21 = vpop.eup %492 }
 0x1ea   :  { %v495_v22 = vpop.eup %494 }
 0x1eb   :  { %v497_v23 = vpop.eup %496  ;;  %v458_v24 = vpack.c.bf16 %v495_v22, %v491_v20 }
 0x1ec   :  { %v456_v25 = vpack.c.bf16 %v497_v23, %v493_v21 }
 0x1ee   :  { %457 = vmatprep.subr.bf16.mxu0 %v456_v25 }
 0x1ef   :  { %459 = vmatpush1.bf16.msra.mxu0 %v458_v24 }
 0x1f2   :  { %439 = vmatmul.mubr.msk.f32.vlgmr.msra.gmra.mrb[8].mxu0 %vm199_vm1, %v309_v26 }
 0x2c5   :  { %v389_v35 = vpop.f32.mrb[8].mxu0 }
 0x2c6   :  { %v390_v36 = vadd.f32 %v389_v35, %v319_v34  ;;  %v391_v37 = vpop.f32.mrb[9].mxu0 }
 0x2c7   :  { %v392_v38 = vadd.f32 %v391_v37, %v319_v34 }
 0x2c9   :  { %v396_v40 = vcombine.low %v390_v36, %v392_v38 }
 0x2cb   :  { %v403_v41 = vrot.slane %v396_v40, %v402_v39 }
 0x2cd   :  { %v410_v42 = vrot.slane %v403_v41, %v402_v39 }
 0x2cf   :  { %416 = vst.msk [vmem:[#allocation3] sm:$0x3] %vm414_vm2, %v410_v42 }
 0x2d0   :  { %509 = shalt.err (!%p506_p4)
}
 0x2d1   :  { %s510_s18 = scalar_lea.hbm %s669_s7, 32 }
 0x2d2   :  { %p511_p5 = scmp.ne.s32.totalorder %s669_s7, %s510_s18  ;;  %p514_p6 = scmp.lt.u32.totalorder %s510_s18, %s669_s7 }
 0x2d4   :  { %p516_p7 = pnand %p514_p6, %p511_p5 }
 0x2d6   :  { %519 = shalt.err (!%p516_p7)
}
 0x2d7   :  { %426 = dma.vmem_to_hbm [thread:$0]  %s424_s15, 32, %s669_s7, [#allocation4]  }
 0x2d8   :  { %520 = dma.done.wait [#allocation4], 32  }
 0x2d9   :  { %521 = vsyncadd [#allocation4], 4294967264 }
 0x2da   :  { %430 = vsyncpa [#allocation4], 1 }

</bundles_post_ra>
